<compile_context>
chip_gen: v6e
topology: v6e:2x2x1
jax: 0.10.0
libtpu: 0.0.40
codegen_flags: <defaults>
</compile_context>

<pallas_src>
import functools

import jax
import jax.numpy as jnp
from jax.experimental import pallas as pl
from jax.experimental.pallas import tpu as pltpu

LANE = 128


def _round_up(x, m):
    return ((x + m - 1) // m) * m


def _posterior_kernel(x_ref, noise_ref, w1_ref, b1_ref, w2_ref, b2_ref,
                      wh_ref, bh_ref, out_ref, *, lp, matmul_dtype):
    md = matmul_dtype

    # Linear -> ReLU  (matmul-dtype MXU operands, f32 accumulation + f32 VPU math)
    x = x_ref[...].astype(md)
    h1 = jnp.dot(x, w1_ref[...], preferred_element_type=jnp.float32) + b1_ref[...]
    h1 = jnp.maximum(h1, 0.0).astype(md)

    # Linear -> ReLU
    h2 = jnp.dot(h1, w2_ref[...], preferred_element_type=jnp.float32) + b2_ref[...]
    h2 = jnp.maximum(h2, 0.0).astype(md)

    # Fused, lane-padded Gaussian head: one matmul producing [TB, 2*lp]
    # with mean in lanes [0, lp) and var_pre in lanes [lp, 2*lp).
    head = jnp.dot(h2, wh_ref[...], preferred_element_type=jnp.float32) + bh_ref[...]
    mean = head[:, :lp]                                  # whole-vreg slice
    var = jnp.logaddexp(head[:, lp:], 0.0)               # softplus (stable)
    z = mean + noise_ref[...] * jnp.sqrt(var + 1e-10)

    # Lane-dense, vreg-aligned stores into the packed [TB, 3*lp] output slab.
    out_ref[:, :lp] = mean
    out_ref[:, lp:2 * lp] = var
    out_ref[:, 2 * lp:] = z


def prepare_kernel_params(params, matmul_dtype=jnp.bfloat16):
    """One-time prep: cast weights to the matmul dtype, lane-pad the fused head.

    Returned dict is what posterior_forward consumes.
    """
    latent = params["w_head"].shape[1] // 2
    lp = _round_up(latent, LANE)
    md = jnp.dtype(matmul_dtype)

    wm, wv = params["w_head"][:, :latent], params["w_head"][:, latent:]
    bm, bv = params["b_head"][:, :latent], params["b_head"][:, latent:]
    pad = ((0, 0), (0, lp - latent))
    w_head_pad = jnp.concatenate([jnp.pad(wm, pad), jnp.pad(wv, pad)], axis=1)
    b_head_pad = jnp.concatenate([jnp.pad(bm, pad), jnp.pad(bv, pad)], axis=1)

    return {
        "w1": params["w1"].astype(md),
        "b1": params["b1"],                      # biases stay f32
        "w2": params["w2"].astype(md),
        "b2": params["b2"],
        "w_head": w_head_pad.astype(md),         # [hidden, 2*lp]
        "b_head": b_head_pad,                    # [1, 2*lp] f32
        "latent_dim": latent,
        "lane_pad": lp,
        "matmul_dtype": md,
    }


def posterior_forward(x, kparams, noise, *, block_b=512):
    """x: [B, input_dim] f32, noise: [B, latent_dim] f32.

    kparams: output of prepare_kernel_params.
    Returns dict(mean, var, z), each [B, latent_dim] f32.
    """
    B, input_dim = x.shape
    hidden_dim = kparams["w1"].shape[1]
    latent_dim = kparams["latent_dim"]
    lp = kparams["lane_pad"]
    md = kparams["matmul_dtype"]

    # Batch tile: rows aligned to the packed-sublane count of the matmul dtype
    # (16 for bf16, 8 for f32), capped at block_b.  Guarantee >= 2 grid steps
    # when the batch allows it (v7x megacore + input double-buffering).
    row_align = 8 * max(1, 4 // md.itemsize)
    b_min = _round_up(B, row_align)
    tb = min(block_b, b_min)
    if b_min // tb < 2 and b_min >= 2 * row_align:
        tb = _round_up((b_min + 1) // 2, row_align)
    b_pad = _round_up(B, tb)
    grid = (b_pad // tb,)

    if b_pad != B:
        x = jnp.pad(x, ((0, b_pad - B), (0, 0)))
    # Pad noise rows to b_pad and lanes to lp (lane-dense load, full-vreg math).
    noise = jnp.pad(noise, ((0, b_pad - B), (0, lp - latent_dim)))

    kernel = functools.partial(_posterior_kernel, lp=lp, matmul_dtype=md)

    # Advisory cost estimate (bf16 weight bytes, padded output accounted for).
    flops = 2 * b_pad * (input_dim * hidden_dim
                         + hidden_dim * hidden_dim
                         + hidden_dim * 2 * lp)
    param_bytes = sum(int(v.size) * v.dtype.itemsize
                      for v in kparams.values() if isinstance(v, jax.Array))
    bytes_accessed = (4 * int(x.size) + 4 * int(noise.size)
                      + param_bytes
                      + 4 * b_pad * 3 * lp)
    cost = pl.CostEstimate(flops=flops,
                           transcendentals=2 * b_pad * lp,
                           bytes_accessed=bytes_accessed)

    out = pl.pallas_call(
        kernel,
        out_shape=jax.ShapeDtypeStruct((b_pad, 3 * lp), jnp.float32),
        grid=grid,
        in_specs=[
            pl.BlockSpec((tb, input_dim), lambda i: (i, 0)),         # x
            pl.BlockSpec((tb, lp), lambda i: (i, 0)),                # noise (padded)
            pl.BlockSpec((input_dim, hidden_dim), lambda i: (0, 0)),  # w1
            pl.BlockSpec((1, hidden_dim), lambda i: (0, 0)),          # b1
            pl.BlockSpec((hidden_dim, hidden_dim), lambda i: (0, 0)), # w2
            pl.BlockSpec((1, hidden_dim), lambda i: (0, 0)),          # b2
            pl.BlockSpec((hidden_dim, 2 * lp), lambda i: (0, 0)),     # w_head (padded)
            pl.BlockSpec((1, 2 * lp), lambda i: (0, 0)),              # b_head (padded)
        ],
        out_specs=pl.BlockSpec((tb, 3 * lp), lambda i: (i, 0)),
        compiler_params=pltpu.CompilerParams(
            dimension_semantics=("parallel",)),
        cost_estimate=cost,
    )(
        x, noise,
        kparams["w1"], kparams["b1"],
        kparams["w2"], kparams["b2"],
        kparams["w_head"], kparams["b_head"],
    )

    mean = out[:B, :latent_dim]
    var = out[:B, lp:lp + latent_dim]
    z = out[:B, 2 * lp:2 * lp + latent_dim]
    return {"mean": mean, "var": var, "z": z}


def init_params(key, input_dim, latent_dim, hidden_dim):
    """Deterministic synthetic init. Weights stored as [in, out] (pre-transposed).

    The Gaussian-head weights (mean | var) are concatenated along the output
    dimension; prepare_kernel_params lane-pads and casts them for the kernel.
    """
    ks = jax.random.split(key, 8)

    def lin(kw, kb, fan_in, fan_out):
        scale = 1.0 / jnp.sqrt(fan_in)
        w = jax.random.uniform(kw, (fan_in, fan_out), jnp.float32, -scale, scale)
        b = jax.random.uniform(kb, (1, fan_out), jnp.float32, -scale, scale)
        return w, b

    w1, b1 = lin(ks[0], ks[1], input_dim, hidden_dim)
    w2, b2 = lin(ks[2], ks[3], hidden_dim, hidden_dim)
    wm, bm = lin(ks[4], ks[5], hidden_dim, latent_dim)
    wv, bv = lin(ks[6], ks[7], hidden_dim, latent_dim)
    w_head = jnp.concatenate([wm, wv], axis=1)      # [hidden, 2*latent]
    b_head = jnp.concatenate([bm, bv], axis=1)      # [1, 2*latent]
    return {"w1": w1, "b1": b1, "w2": w2, "b2": b2,
            "w_head": w_head, "b_head": b_head}


def reference_forward(x, params, noise):
    """Pure-JAX f32 reference of the same math (for a sanity check)."""
    latent_dim = params["w_head"].shape[1] // 2
    h1 = jnp.maximum(x @ params["w1"] + params["b1"], 0.0)
    h2 = jnp.maximum(h1 @ params["w2"] + params["b2"], 0.0)
    head = h2 @ params["w_head"] + params["b_head"]
    mean = head[:, :latent_dim]
    var = jax.nn.softplus(head[:, latent_dim:])
    z = mean + noise * jnp.sqrt(var + 1e-10)
    return {"mean": mean, "var": var, "z": z}


if __name__ == "__main__":
    input_dim, latent_dim, hidden_dim = 32, 16, 64
    batch = 8

    key = jax.random.PRNGKey(0)
    k_param, k_x, k_noise = jax.random.split(key, 3)

    params = init_params(k_param, input_dim, latent_dim, hidden_dim)
    x = jax.random.normal(k_x, (batch, input_dim), jnp.float32)
    noise = jax.random.normal(k_noise, (batch, latent_dim), jnp.float32)

    ref = reference_forward(x, params, noise)

    # Exact-semantics check: f32 matmuls, tight tolerance.
    kp_f32 = prepare_kernel_params(params, matmul_dtype=jnp.float32)
    out_f32 = posterior_forward(x, kp_f32, noise)
    jax.block_until_ready(out_f32)
    for name in ("mean", "var", "z"):
        assert jnp.allclose(out_f32[name], ref[name], atol=1e-5, rtol=1e-5), name

    # Performance config (default): bf16 weights/operands, f32 accumulation.
    kp_bf16 = prepare_kernel_params(params, matmul_dtype=jnp.bfloat16)
    out_bf16 = posterior_forward(x, kp_bf16, noise)
    jax.block_until_ready(out_bf16)
    for name in ("mean", "var", "z"):
        assert jnp.allclose(out_bf16[name], ref[name], atol=5e-2, rtol=5e-2), name

    print("KERNEL_OK")
</pallas_src>

<mosaic_0001>
module attributes {stable_mosaic.version = 11 : i64} {
  func.func @_posterior_kernel(%arg0: i32, %arg1: memref<8x32xf32, #tpu.memory_space<vmem>>, %arg2: memref<8x128xf32, #tpu.memory_space<vmem>>, %arg3: memref<32x64xf32, #tpu.memory_space<vmem>>, %arg4: memref<1x64xf32, #tpu.memory_space<vmem>>, %arg5: memref<64x64xf32, #tpu.memory_space<vmem>>, %arg6: memref<1x64xf32, #tpu.memory_space<vmem>>, %arg7: memref<64x256xf32, #tpu.memory_space<vmem>>, %arg8: memref<1x256xf32, #tpu.memory_space<vmem>>, %arg9: memref<8x384xf32, #tpu.memory_space<vmem>>) attributes {dimension_semantics = [#tpu.dimension_semantics<parallel>], iteration_bounds = array<i64: 1>, scalar_prefetch = 0 : i64, scratch_operands = 0 : i64, tpu.core_type = #tpu.core_type<tc>, window_params = [{transform_indices = @transform_0, window_bounds = array<i64: 8, 32>}, {transform_indices = @transform_1, window_bounds = array<i64: 8, 128>}, {pipeline_mode = #tpu.pipeline_mode<synchronous>, transform_indices = @transform_2, window_bounds = array<i64: 32, 64>}, {pipeline_mode = #tpu.pipeline_mode<synchronous>, transform_indices = @transform_3, window_bounds = array<i64: 1, 64>}, {pipeline_mode = #tpu.pipeline_mode<synchronous>, transform_indices = @transform_4, window_bounds = array<i64: 64, 64>}, {pipeline_mode = #tpu.pipeline_mode<synchronous>, transform_indices = @transform_5, window_bounds = array<i64: 1, 64>}, {pipeline_mode = #tpu.pipeline_mode<synchronous>, transform_indices = @transform_6, window_bounds = array<i64: 64, 256>}, {pipeline_mode = #tpu.pipeline_mode<synchronous>, transform_indices = @transform_7, window_bounds = array<i64: 1, 256>}, {transform_indices = @transform_8, window_bounds = array<i64: 8, 384>}]} {
    %c0 = arith.constant 0 : index
    %c0_0 = arith.constant 0 : index
    %0 = vector.load %arg1[%c0, %c0_0] : memref<8x32xf32, #tpu.memory_space<vmem>>, vector<8x32xf32>
    %c0_1 = arith.constant 0 : index
    %c0_2 = arith.constant 0 : index
    %1 = vector.load %arg3[%c0_1, %c0_2] : memref<32x64xf32, #tpu.memory_space<vmem>>, vector<32x64xf32>
    %cst = arith.constant dense<0.000000e+00> : vector<8x64xf32>
    %2 = tpu.matmul %0, %1, %cst {dimension_numbers = #tpu.dot_dimension_numbers<[1], [0], [0], [1], [0, 0, 1, 1], [], []>} : vector<8x32xf32>, vector<32x64xf32>, vector<8x64xf32> -> vector<8x64xf32>
    %c0_3 = arith.constant 0 : index
    %c0_4 = arith.constant 0 : index
    %3 = vector.load %arg4[%c0_3, %c0_4] : memref<1x64xf32, #tpu.memory_space<vmem>>, vector<1x64xf32>
    %4 = vector.broadcast %3 : vector<1x64xf32> to vector<8x64xf32>
    %5 = arith.addf %2, %4 : vector<8x64xf32>
    %cst_5 = arith.constant 0.000000e+00 : f32
    %6 = vector.broadcast %cst_5 : f32 to vector<8x64xf32>
    %7 = arith.maximumf %5, %6 : vector<8x64xf32>
    %c0_6 = arith.constant 0 : index
    %c0_7 = arith.constant 0 : index
    %8 = vector.load %arg5[%c0_6, %c0_7] : memref<64x64xf32, #tpu.memory_space<vmem>>, vector<64x64xf32>
    %cst_8 = arith.constant dense<0.000000e+00> : vector<8x64xf32>
    %9 = tpu.matmul %7, %8, %cst_8 {dimension_numbers = #tpu.dot_dimension_numbers<[1], [0], [0], [1], [0, 0, 1, 1], [], []>} : vector<8x64xf32>, vector<64x64xf32>, vector<8x64xf32> -> vector<8x64xf32>
    %c0_9 = arith.constant 0 : index
    %c0_10 = arith.constant 0 : index
    %10 = vector.load %arg6[%c0_9, %c0_10] : memref<1x64xf32, #tpu.memory_space<vmem>>, vector<1x64xf32>
    %11 = vector.broadcast %10 : vector<1x64xf32> to vector<8x64xf32>
    %12 = arith.addf %9, %11 : vector<8x64xf32>
    %cst_11 = arith.constant 0.000000e+00 : f32
    %13 = vector.broadcast %cst_11 : f32 to vector<8x64xf32>
    %14 = arith.maximumf %12, %13 : vector<8x64xf32>
    %c0_12 = arith.constant 0 : index
    %c0_13 = arith.constant 0 : index
    %15 = vector.load %arg7[%c0_12, %c0_13] : memref<64x256xf32, #tpu.memory_space<vmem>>, vector<64x256xf32>
    %cst_14 = arith.constant dense<0.000000e+00> : vector<8x256xf32>
    %16 = tpu.matmul %14, %15, %cst_14 {dimension_numbers = #tpu.dot_dimension_numbers<[1], [0], [0], [1], [0, 0, 1, 1], [], []>} : vector<8x64xf32>, vector<64x256xf32>, vector<8x256xf32> -> vector<8x256xf32>
    %c0_15 = arith.constant 0 : index
    %c0_16 = arith.constant 0 : index
    %17 = vector.load %arg8[%c0_15, %c0_16] : memref<1x256xf32, #tpu.memory_space<vmem>>, vector<1x256xf32>
    %18 = vector.broadcast %17 : vector<1x256xf32> to vector<8x256xf32>
    %19 = arith.addf %16, %18 : vector<8x256xf32>
    %20 = vector.extract_strided_slice %19 {offsets = [0, 0], sizes = [8, 128], strides = [1, 1]} : vector<8x256xf32> to vector<8x128xf32>
    %21 = vector.extract_strided_slice %19 {offsets = [0, 128], sizes = [8, 128], strides = [1, 1]} : vector<8x256xf32> to vector<8x128xf32>
    %cst_17 = arith.constant 0.000000e+00 : f32
    %22 = vector.broadcast %cst_17 : f32 to vector<8x128xf32>
    %23 = arith.maximumf %21, %22 : vector<8x128xf32>
    %24 = vector.broadcast %cst_17 : f32 to vector<8x128xf32>
    %25 = arith.subf %21, %24 : vector<8x128xf32>
    %26 = arith.cmpf one, %25, %25 : vector<8x128xf32>
    %27 = vector.broadcast %cst_17 : f32 to vector<8x128xf32>
    %28 = arith.addf %21, %27 : vector<8x128xf32>
    %29 = math.absf %25 : vector<8x128xf32>
    %cst_18 = arith.constant 0.000000e+00 : f32
    %30 = vector.broadcast %cst_18 : f32 to vector<8x128xf32>
    %31 = arith.subf %30, %29 : vector<8x128xf32>
    %32 = math.exp %31 : vector<8x128xf32>
    %33 = math.log1p %32 : vector<8x128xf32>
    %34 = arith.addf %23, %33 : vector<8x128xf32>
    %35 = arith.select %26, %28, %34 : vector<8x128xi1>, vector<8x128xf32>
    %c0_19 = arith.constant 0 : index
    %c0_20 = arith.constant 0 : index
    %36 = vector.load %arg2[%c0_19, %c0_20] : memref<8x128xf32, #tpu.memory_space<vmem>>, vector<8x128xf32>
    %cst_21 = arith.constant 1.000000e-10 : f32
    %37 = vector.broadcast %cst_21 : f32 to vector<8x128xf32>
    %38 = arith.addf %35, %37 : vector<8x128xf32>
    %39 = math.sqrt %38 : vector<8x128xf32>
    %40 = arith.mulf %36, %39 : vector<8x128xf32>
    %41 = arith.addf %20, %40 : vector<8x128xf32>
    %c0_22 = arith.constant 0 : index
    %c0_23 = arith.constant 0 : index
    %42 = vector.load %arg9[%c0_22, %c0_23] : memref<8x384xf32, #tpu.memory_space<vmem>>, vector<8x128xf32>
    tpu.vector_store %arg9[%c0_22, %c0_23], %20 {strides = array<i32>} : memref<8x384xf32, #tpu.memory_space<vmem>>, vector<8x128xf32>,
    %c0_24 = arith.constant 0 : index
    %c128 = arith.constant 128 : index
    %43 = vector.load %arg9[%c0_24, %c128] : memref<8x384xf32, #tpu.memory_space<vmem>>, vector<8x128xf32>
    tpu.vector_store %arg9[%c0_24, %c128], %35 {strides = array<i32>} : memref<8x384xf32, #tpu.memory_space<vmem>>, vector<8x128xf32>,
    %c0_25 = arith.constant 0 : index
    %c256 = arith.constant 256 : index
    %44 = vector.load %arg9[%c0_25, %c256] : memref<8x384xf32, #tpu.memory_space<vmem>>, vector<8x128xf32>
    tpu.vector_store %arg9[%c0_25, %c256], %41 {strides = array<i32>} : memref<8x384xf32, #tpu.memory_space<vmem>>, vector<8x128xf32>,
    return
  }
  func.func @transform_0(%arg0: i32) -> (i32, i32) {
    %c0_i32 = arith.constant 0 : i32
    %c0_i32_0 = arith.constant 0 : i32
    return %arg0, %c0_i32 : i32, i32
  }
  func.func @transform_1(%arg0: i32) -> (i32, i32) {
    %c0_i32 = arith.constant 0 : i32
    %c0_i32_0 = arith.constant 0 : i32
    return %arg0, %c0_i32 : i32, i32
  }
  func.func @transform_2(%arg0: i32) -> (i32, i32) {
    %c0_i32 = arith.constant 0 : i32
    %c0_i32_0 = arith.constant 0 : i32
    %c0_i32_1 = arith.constant 0 : i32
    return %c0_i32, %c0_i32_0 : i32, i32
  }
  func.func @transform_3(%arg0: i32) -> (i32, i32) {
    %c0_i32 = arith.constant 0 : i32
    %c0_i32_0 = arith.constant 0 : i32
    %c0_i32_1 = arith.constant 0 : i32
    return %c0_i32, %c0_i32_0 : i32, i32
  }
  func.func @transform_4(%arg0: i32) -> (i32, i32) {
    %c0_i32 = arith.constant 0 : i32
    %c0_i32_0 = arith.constant 0 : i32
    %c0_i32_1 = arith.constant 0 : i32
    return %c0_i32, %c0_i32_0 : i32, i32
  }
  func.func @transform_5(%arg0: i32) -> (i32, i32) {
    %c0_i32 = arith.constant 0 : i32
    %c0_i32_0 = arith.constant 0 : i32
    %c0_i32_1 = arith.constant 0 : i32
    return %c0_i32, %c0_i32_0 : i32, i32
  }
  func.func @transform_6(%arg0: i32) -> (i32, i32) {
    %c0_i32 = arith.constant 0 : i32
    %c0_i32_0 = arith.constant 0 : i32
    %c0_i32_1 = arith.constant 0 : i32
    return %c0_i32, %c0_i32_0 : i32, i32
  }
  func.func @transform_7(%arg0: i32) -> (i32, i32) {
    %c0_i32 = arith.constant 0 : i32
    %c0_i32_0 = arith.constant 0 : i32
    %c0_i32_1 = arith.constant 0 : i32
    return %c0_i32, %c0_i32_0 : i32, i32
  }
  func.func @transform_8(%arg0: i32) -> (i32, i32) {
    %c0_i32 = arith.constant 0 : i32
    %c0_i32_0 = arith.constant 0 : i32
    return %arg0, %c0_i32 : i32, i32
  }
}

</mosaic_0001>

<bundles_post_ra>
// kernel: tpu_custom_call.1
= control target key start
LH: loop header
LB: loop body
LE: loop exit
PB: predicated region body
PF: predicated region fallthrough
CT: control target
= control target key end

     0   :  { %13 = vsyncpa [#allocation3], 0  ;;  %s703_s0 = inlined_call_operand.hbm [shape: f32[8,32], index: 0, kind: input, shape index: {}]   ;;  %s704_s1 = inlined_call_operand.hbm [shape: f32[8,128], index: 1, kind: input, shape index: {}]   ;;  %s705_s2 = inlined_call_operand.hbm [shape: f32[32,64], index: 2, kind: input, shape index: {}]   ;;  %s706_s3 = inlined_call_operand.vmem [shape: f32[1,64], index: 3, kind: input, shape index: {}]   ;;  %s707_s4 = inlined_call_operand.hbm [shape: f32[64,64], index: 4, kind: input, shape index: {}]   ;;  %s708_s5 = inlined_call_operand.vmem [shape: f32[1,64], index: 5, kind: input, shape index: {}]   ;;  %s709_s6 = inlined_call_operand.hbm [shape: f32[64,256], index: 6, kind: input, shape index: {}]   ;;  %s710_s7 = inlined_call_operand.vmem [shape: f32[1,256], index: 7, kind: input, shape index: {}]   ;;  %s711_s8 = inlined_call_operand.hbm [shape: f32[8,384], index: 8, kind: output, shape index: {}]  }
   0x1   :  { %14 = vsyncpa [#allocation6], 0 }
   0x2   :  { %15 = vsyncpa [#allocation9], 0 }
   0x3   :  { %16 = vsyncpa [#allocation4], 0  ;;  %s617_s27 = smov [#allocation5]  }
   0x4   :  { %s33_s28 = sshll.u32 %s617_s27, 4  ;;  %s34_s28 = int_to_ptr.vmem [resolvable:$true] %s33_s28 }
   0x5   :  { %s497_s29 = scalar_lea.vmem %s34_s28, 128  ;;  %p502_p1 = scmp.lt.s32.totalorder %s34_s28, %s34_s28 }
   0x6   :  { %p498_p0 = scmp.ne.s32.totalorder %s34_s28, %s497_s29  ;;  %p503_p2 = scmp.lt.s32.totalorder %s497_s29, %s497_s29 }
   0x8   :  { %p504_p3 = por %p503_p2, %p502_p1 }
   0xa   :  { %p505_p4 = pnand %p504_p3, %p498_p0 }
   0xc   :  { %508 = shalt.err (!%p505_p4)
}
   0xd   :  { %36 = dma.hbm_to_vmem [thread:$0]  %s704_s1, 128, %s34_s28, [#allocation6]  }
   0xe   :  { %s618_s10 = smov [#allocation8]   ;;  %s619_s12 = smov [#allocation2]  }
   0xf   :  { %s56_s11 = sshll.u32 %s618_s10, 4  ;;  %s23_s13 = sshll.u32 %s619_s12, 4  ;;  %s57_s11 = int_to_ptr.vmem [resolvable:$true] %s56_s11  ;;  %s24_s13 = int_to_ptr.vmem [resolvable:$true] %s23_s13 }
  0x10   :  { %s517_s14 = scalar_lea.vmem %s57_s11, 1024  ;;  %p522_p6 = scmp.lt.s32.totalorder %s57_s11, %s57_s11 }
  0x11   :  { %p518_p5 = scmp.ne.s32.totalorder %s57_s11, %s517_s14  ;;  %p523_p7 = scmp.lt.s32.totalorder %s517_s14, %s517_s14 }
  0x13   :  { %p524_p8 = por %p523_p7, %p522_p6 }
  0x15   :  { %p525_p9 = pnand %p524_p8, %p518_p5 }
  0x17   :  { %528 = shalt.err (!%p525_p9)
}
  0x18   :  { %s620_s15 = smov 128   ;;  %s621_s16 = smov 8  }
  0x19   :  { %62 = dma.hbm_to_vmem [thread:$0]  %s707_s4, 1024, %s57_s11, [#allocation9], %s620_s15, %s620_s15, %s621_s16  }
  0x1a   :  { %s537_s1 = scalar_lea.vmem %s24_s13, 128  ;;  %p542_p11 = scmp.lt.s32.totalorder %s24_s13, %s24_s13 }
  0x1b   :  { %p538_p10 = scmp.ne.s32.totalorder %s24_s13, %s537_s1  ;;  %p543_p12 = scmp.lt.s32.totalorder %s537_s1, %s537_s1 }
  0x1d   :  { %p544_p13 = por %p543_p12, %p542_p11 }
  0x1f   :  { %p545_p0 = pnand %p544_p13, %p538_p10 }
  0x21   :  { %548 = shalt.err (!%p545_p0)
}
  0x22   :  { %26 = dma.hbm_to_vmem [thread:$0]  %s703_s0, 128, %s24_s13, [#allocation3]  }
  0x23   :  { %s622_s21 = smov [#allocation7]   ;;  %s623_s23 = smov [#allocation10]  }
  0x24   :  { %s42_s22 = sshll.u32 %s622_s21, 4  ;;  %s70_s24 = sshll.u32 %s623_s23, 4  ;;  %s43_s22 = int_to_ptr.vmem [resolvable:$true] %s42_s22  ;;  %s71_s24 = int_to_ptr.vmem [resolvable:$true] %s70_s24 }
  0x25   :  { %s557_s25 = scalar_lea.vmem %s43_s22, 512  ;;  %p562_p2 = scmp.lt.s32.totalorder %s43_s22, %s43_s22 }
  0x26   :  { %p558_p1 = scmp.ne.s32.totalorder %s43_s22, %s557_s25  ;;  %p563_p3 = scmp.lt.s32.totalorder %s557_s25, %s557_s25 }
  0x28   :  { %p564_p4 = por %p563_p3, %p562_p2 }
  0x2a   :  { %p565_p5 = pnand %p564_p4, %p558_p1 }
  0x2c   :  { %568 = shalt.err (!%p565_p5)
}
  0x2d   :  { %48 = dma.hbm_to_vmem [thread:$0]  %s705_s2, 512, %s43_s22, [#allocation6], %s620_s15, %s620_s15, %s621_s16  }
  0x2e   :  { %s577_s27 = scalar_lea.vmem %s71_s24, 2048  ;;  %p582_p7 = scmp.lt.s32.totalorder %s71_s24, %s71_s24 }
  0x2f   :  { %p578_p6 = scmp.ne.s32.totalorder %s71_s24, %s577_s27  ;;  %p583_p8 = scmp.lt.s32.totalorder %s577_s27, %s577_s27 }
  0x31   :  { %p584_p9 = por %p583_p8, %p582_p7 }
  0x33   :  { %p585_p10 = pnand %p584_p9, %p578_p6 }
  0x35   :  { %588 = shalt.err (!%p585_p10)
}
  0x36   :  { %s624_s0 = smov 256   ;;  %s625_s28 = smov 16  }
  0x37   :  { %76 = dma.hbm_to_vmem [thread:$0]  %s709_s6, 2048, %s71_s24, [#allocation9], %s624_s0, %s624_s0, %s625_s28  }
  0x38   :  { %609 = dma.done.wait [#allocation3], 128  }
  0x39   :  { %610 = vsyncadd [#allocation3], 4294967168 }
  0x3a   :  { %611 = dma.done.wait [#allocation6], 640  }
  0x3b   :  { %612 = vsyncadd [#allocation6], 4294966656 }
  0x3c   :  { %613 = dma.done.wait [#allocation9], 3072  }
  0x3d   :  { %614 = vsyncadd [#allocation9], 4294964224  ;;  %v626_v0 = vmov 0.0   ;;  %vm627_vm0 = vmmov 0   ;;  %v98_v1 = vld [vmem:[#allocation7 + $0x18] sm:$0xff]  ;;  %v97_v2 = vld [vmem:[#allocation7 + $0x10] sm:$0xff]  ;;  %v289_v40 = vlaneseq }
  0x3e   :  { %441 = vmatprep.subr.mxu0 %v626_v0  ;;  %449 = vmatprep.mubr.msk.f32.mxu0 %vm627_vm0, %v626_v0  ;;  %v188_v3 = vld [vmem:[#allocation8 + $0x38] sm:$0xff]  ;;  %v96_v4 = vld [vmem:[#allocation7 + $0x8] sm:$0xff]  ;;  %v187_v5 = vld [vmem:[#allocation8 + $0x30] sm:$0xff]  ;;  %vm106_vm1 = vcmask 261120   ;;  %vm196_vm2 = vcmask 523264  }
  0x3f   :  { %452 = vmatprep.subr.mxu1 %v626_v0  ;;  %468 = vmatprep.mubr.msk.f32.mxu1 %vm627_vm0, %v626_v0  ;;  %v186_v6 = vld [vmem:[#allocation8 + $0x28] sm:$0xff]  ;;  %v95_v7 = vld [vmem:[#allocation7] sm:$0xff]  ;;  %v94_v8 = vld [vmem:[#allocation2] sm:$0xff]  ;;  %v290_v41 = vshrl.u32 %v289_v40, 7 }
  0x40   :  { %442 = vmatpush3.msra.mxu0 %v98_v1  ;;  %453 = vmatpush3.msra.mxu1 %v188_v3  ;;  %v185_v9 = vld [vmem:[#allocation8 + $0x20] sm:$0xff]  ;;  %v184_v10 = vld [vmem:[#allocation8 + $0x18] sm:$0xff]  ;;  %v183_v11 = vld [vmem:[#allocation8 + $0x10] sm:$0xff] }
  0x41   :  { %443 = vmatprep.subr.mxu0 %v626_v0  ;;  %454 = vmatprep.subr.mxu1 %v626_v0  ;;  %v182_v12 = vld [vmem:[#allocation8 + $0x8] sm:$0xff]  ;;  %v181_v13 = vld [vmem:[#allocation8] sm:$0xff]  ;;  %v286_v14 = vld [vmem:[#allocation10 + $0x78] sm:$0xff]  ;;  %v291_v42 = vsub.s32 0, %v290_v41  ;;  %v295_v44 = vsub.s32 1, %v290_v41 }
  0x42   :  { %444 = vmatpush3.msra.mxu0 %v97_v2  ;;  %455 = vmatpush3.msra.mxu1 %v187_v5  ;;  %v285_v15 = vld [vmem:[#allocation10 + $0x70] sm:$0xff]  ;;  %v284_v16 = vld [vmem:[#allocation10 + $0x68] sm:$0xff]  ;;  %v283_v17 = vld [vmem:[#allocation10 + $0x60] sm:$0xff] }
  0x43   :  { %445 = vmatprep.subr.mxu0 %v626_v0  ;;  %456 = vmatprep.subr.mxu1 %v626_v0  ;;  %v282_v18 = vld [vmem:[#allocation10 + $0x58] sm:$0xff]  ;;  %v281_v19 = vld [vmem:[#allocation10 + $0x50] sm:$0xff]  ;;  %v280_v20 = vld [vmem:[#allocation10 + $0x48] sm:$0xff] }
  0x44   :  { %446 = vmatpush3.msra.mxu0 %v96_v4  ;;  %457 = vmatpush3.msra.mxu1 %v186_v6  ;;  %v279_v21 = vld [vmem:[#allocation10 + $0x40] sm:$0xff]  ;;  %v278_v22 = vld [vmem:[#allocation10 + $0x38] sm:$0xff]  ;;  %v277_v23 = vld [vmem:[#allocation10 + $0x30] sm:$0xff] }
  0x45   :  { %447 = vmatprep.subr.mxu0 %v626_v0  ;;  %458 = vmatprep.subr.mxu1 %v626_v0  ;;  %v276_v24 = vld [vmem:[#allocation10 + $0x28] sm:$0xff]  ;;  %v422_v25 = vld [vmem:[%s706_s3] ss:$0 sm:$0xff]  ;;  %v275_v30 = vld [vmem:[#allocation10 + $0x20] sm:$0xff] }
  0x46   :  { %448 = vmatpush3.msra.mxu0 %v95_v7  ;;  %459 = vmatpush3.msra.mxu1 %v185_v9  ;;  %v274_v31 = vld [vmem:[#allocation10 + $0x18] sm:$0xff]  ;;  %v273_v32 = vld [vmem:[#allocation10 + $0x10] sm:$0xff]  ;;  %v272_v33 = vld [vmem:[#allocation10 + $0x8] sm:$0xff] }
  0x47   :  { %450 = vmatmul.mubr.msk.f32.vlgmr.msra.gmra.mxu0 %vm106_vm1, %v94_v8  ;;  %460 = vmatprep.subr.mxu1 %v626_v0  ;;  %v271_v34 = vld [vmem:[#allocation10] sm:$0xff]  ;;  %v424_v35 = vld [vmem:[%s708_s5] ss:$0 sm:$0xff]  ;;  %v391_v5 = vld [vmem:[#allocation5] sm:$0xff]  ;;  %s628_s5 = smov [#allocation11]  }
  0x48   :  { %366 = vmatprep.mubr.f32.mxu0 %v626_v0  ;;  %461 = vmatpush3.msra.mxu1 %v184_v10  ;;  %v287_v43 = vld [vmem:[%s710_s7] sm:$0x3]  ;;  %s411_s7 = sshll.u32 %s628_s5, 4  ;;  %s412_s7 = int_to_ptr.vmem [resolvable:$true] %s411_s7 }
  0x49   :  { %462 = vmatprep.subr.mxu1 %v626_v0  ;;  %318 = vmatprep.subr.mxu0 %v286_v14  ;;  %v292_v45 = vrot.slane %v287_v43, %v291_v42  ;;  %v296_v46 = vrot.slane %v287_v43, %v295_v44  ;;  %s589_s12 = scalar_lea.vmem %s412_s7, 384  ;;  %p594_p12 = scmp.lt.s32.totalorder %s412_s7, %s412_s7 }
  0x4a   :  { %463 = vmatpush3.msra.mxu1 %v183_v11  ;;  %319 = vmatpush1.msra.mxu0 %v285_v15  ;;  %p590_p11 = scmp.ne.s32.totalorder %s412_s7, %s589_s12  ;;  %p595_p13 = scmp.lt.s32.totalorder %s589_s12, %s589_s12 }
  0x4b   :  { %464 = vmatprep.subr.mxu1 %v626_v0  ;;  %320 = vmatprep.subr.mxu0 %v284_v16 }
  0x4c   :  { %465 = vmatpush3.msra.mxu1 %v182_v12  ;;  %321 = vmatpush1.msra.mxu0 %v283_v17  ;;  %p596_p0 = por %p595_p13, %p594_p12 }
  0x4d   :  { %466 = vmatprep.subr.mxu1 %v626_v0  ;;  %322 = vmatprep.subr.mxu0 %v282_v18 }
  0x4e   :  { %467 = vmatpush3.msra.mxu1 %v181_v13  ;;  %323 = vmatpush1.msra.mxu0 %v281_v19  ;;  %p597_p1 = pnand %p596_p0, %p590_p11 }
  0x4f   :  { %324 = vmatprep.subr.mxu0 %v280_v20 }
  0x50   :  { %325 = vmatpush1.msra.mxu0 %v279_v21 }
  0x51   :  { %326 = vmatprep.subr.mxu0 %v278_v22 }
  0x52   :  { %327 = vmatpush1.msra.mxu0 %v277_v23 }
  0x53   :  { %328 = vmatprep.subr.mxu0 %v276_v24 }
  0x54   :  { %329 = vmatpush1.msra.mxu0 %v275_v30 }
  0x55   :  { %330 = vmatprep.subr.mxu0 %v274_v31 }
  0x56   :  { %331 = vmatpush1.msra.mxu0 %v273_v32 }
  0x57   :  { %332 = vmatprep.subr.mxu0 %v272_v33 }
  0x58   :  { %333 = vmatpush1.msra.mxu0 %v271_v34 }
 0x107   :  { %v176_v26 = vpop.f32.mrf.mxu0 }
 0x108   :  { %v177_v27 = vadd.f32 %v422_v25, %v176_v26 }
 0x109   :  { %v451_v28 = vpop.f32.mrf.mxu0 }
 0x10a   :  { %v180_v29 = vmax.f32 %v177_v27, 0.0 }
 0x10c   :  { %469 = vmatmul.mubr.msk.f32.vlgmr.msra.gmra.mxu1 %vm196_vm2, %v180_v29 }
 0x1cc   :  { %v266_v36 = vpop.f32.mrf.mxu1 }
 0x1cd   :  { %v267_v37 = vadd.f32 %v424_v35, %v266_v36 }
 0x1ce   :  { %v470_v38 = vpop.f32.mrf.mxu1 }
 0x1cf   :  { %v270_v39 = vmax.f32 %v267_v37, 0.0 }
 0x1d1   :  { %426 = vmatmul.mubr.msk.f32.vlgmr.msra.gmra.mxu0 %vm196_vm2, %v270_v39 }
 0x291   :  { %v368_v47 = vpop.f32.mrf.mxu0 }
 0x292   :  { %v369_v48 = vadd.f32 %v368_v47, %v292_v45 }
 0x293   :  { %v370_v49 = vpop.f32.mrf.mxu0 }
 0x294   :  { %402 = vst [vmem:[#allocation11] sm:$0xff] %v369_v48  ;;  %v371_v50 = vadd.f32 %v370_v49, %v296_v46 }
 0x296   :  { %v376_v51 = vand.u32 2147483647, %v371_v50  ;;  %v373_v62 = vmax.f32 %v371_v50, 0.0  ;;  %vm374_vm4 = vcmp.ne.f32.partialorder %v371_v50, %v371_v50 }
 0x298   :  { %v377_v52 = vsub.f32 0.0, %v376_v51 }
 0x29a   :  { %v378_v53 = vmul.f32 1.442695, %v377_v52 }
 0x29c   :  { %483 = vpow2.f32 %v378_v53 }
 0x2a9   :  { %v484_v54 = vpop.eup %483 }
 0x2aa   :  { %v380_v55 = vadd.f32 1.0, %v484_v54  ;;  %v383_v56 = vmul.f32 -0.5, %v484_v54  ;;  %v386_v58 = vand.u32 2147483647, %v484_v54 }
 0x2ac   :  { %485 = vlog2.f32 %v380_v55  ;;  %v384_v57 = vadd.f32 1.0, %v383_v56  ;;  %vm387_vm3 = vcmp.lt.f32.partialorder %v386_v58, 0.0004427343 }
 0x2ae   :  { %v385_v61 = vmul.f32 %v484_v54, %v384_v57 }
 0x2b9   :  { %v486_v59 = vpop.eup %485 }
 0x2ba   :  { %v382_v60 = vmul.f32 0.6931472, %v486_v59 }
 0x2bc   :  { %v388_v63 = vsel %vm387_vm3, %v385_v61, %v382_v60 }
 0x2bd   :  { %v389_v0 = vadd.f32 %v388_v63, %v373_v62 }
 0x2bf   :  { %v390_v1 = vsel %vm374_vm4, %v371_v50, %v389_v0 }
 0x2c0   :  { %v392_v2 = vadd.f32 1e-10, %v390_v1  ;;  %403 = vst [vmem:[#allocation11 + $0x8] sm:$0xff] %v390_v1 }
 0x2c2   :  { %487 = vrsqrt.f32 %v392_v2  ;;  %vm395_vm5 = vcmp.eq.f32.partialorder %v392_v2, inf  ;;  %v398_v6 = vand.u32 2147483648, %v392_v2  ;;  %vm397_vm6 = vcmp.eq.f32.partialorder %v392_v2, 0.0 }
 0x2cf   :  { %v488_v3 = vpop.eup %487 }
 0x2d0   :  { %v394_v4 = vmul.f32 %v488_v3, %v392_v2 }
 0x2d2   :  { %v396_v7 = vsel %vm395_vm5, %v392_v2, %v394_v4 }
 0x2d3   :  { %v399_v8 = vsel %vm397_vm6, %v398_v6, %v396_v7 }
 0x2d4   :  { %v400_v9 = vmul.f32 %v399_v8, %v391_v5 }
 0x2d6   :  { %v401_v10 = vadd.f32 %v400_v9, %v369_v48 }
 0x2d8   :  { %404 = vst [vmem:[#allocation11 + $0x10] sm:$0xff] %v401_v10 }
 0x2d9   :  { %600 = shalt.err (!%p597_p1)
}
 0x2da   :  { %414 = dma.vmem_to_hbm [thread:$0]  %s412_s7, 384, %s711_s8, [#allocation4]  }
 0x2db   :  { %615 = dma.done.wait [#allocation4], 384  }
 0x2dc   :  { %616 = vsyncadd [#allocation4], 4294966912 }
 0x2dd   :  { %418 = vsyncpa [#allocation3], 1 }
 0x2de   :  { %419 = vsyncpa [#allocation6], 1 }
 0x2df   :  { %420 = vsyncpa [#allocation9], 1 }
 0x2e0   :  { %421 = vsyncpa [#allocation4], 1 }

</bundles_post_ra>
